<compile_context>
chip_gen: v6e
topology: v6e:2x2x1
jax: 0.10.0
libtpu: 0.0.40
codegen_flags: <defaults>
</compile_context>

<pallas_src>
import jax
import jax.numpy as jnp
from jax import lax
from jax.experimental import pallas as pl
from jax.experimental.pallas import tpu as pltpu  # noqa: F401  (TPU backend)


def add_conv1x1_kernel(a_ref, b_ref, w_ref, o_ref):
    # a_ref, b_ref: (Cin, HW) f32   w_ref: (Cout, Cin) f32   o_ref: (Cout, HW) f32
    # Elementwise add on the VPU; cast operands to bf16 so the MXU runs a single
    # pass (f32 operands would lower to multi-pass bf16); accumulate in f32.
    s = (a_ref[...] + b_ref[...]).astype(jnp.bfloat16)
    w = w_ref[...].astype(jnp.bfloat16)
    # 1x1 conv == matmul on the MXU: contract Cin (dim 1 of W, dim 0 of s).
    o_ref[...] = lax.dot_general(
        w, s,
        dimension_numbers=(((1,), (0,)), ((), ())),
        preferred_element_type=jnp.float32,
    ).astype(o_ref.dtype)


def add_conv1x1(x145_nchw, x136_nchw, weight_oi):
    """x145, x136: (1, Cin, H, W) float32; weight_oi: (Cout, Cin) float32.
    Returns (1, Cout, H, W), matching PyTorch Conv2d(96, 288, 1, bias=False)
    applied to (x145 + x136)."""
    N, Cin, H, W = x145_nchw.shape
    Cout = weight_oi.shape[0]
    assert N == 1, "kernel specialized to batch=1 as in the reference module"
    HW = H * W

    # NCHW (N=1) -> (Cin, H*W): pure reshape, no data movement.
    a = x145_nchw.reshape(Cin, HW)
    b = x136_nchw.reshape(Cin, HW)

    flops = 2 * HW * Cin * Cout
    bytes_accessed = (2 * Cin * HW + Cin * Cout + Cout * HW) * 4

    out_flat = pl.pallas_call(
        add_conv1x1_kernel,
        out_shape=jax.ShapeDtypeStruct((Cout, HW), x145_nchw.dtype),
        in_specs=[
            pl.BlockSpec((Cin, HW), lambda: (0, 0)),
            pl.BlockSpec((Cin, HW), lambda: (0, 0)),
            pl.BlockSpec((Cout, Cin), lambda: (0, 0)),
        ],
        out_specs=pl.BlockSpec((Cout, HW), lambda: (0, 0)),
        cost_estimate=pl.CostEstimate(
            flops=flops, transcendentals=0, bytes_accessed=bytes_accessed
        ),
    )(a, b, weight_oi)

    # (Cout, H*W) -> (1, Cout, H, W): pure reshape, no data movement.
    return out_flat.reshape(1, Cout, H, W)


if __name__ == "__main__":
    key = jax.random.PRNGKey(0)
    k1, k2, k3 = jax.random.split(key, 3)

    # Shapes from the reference module: x145/x136 are (1, 96, 14, 14),
    # Conv2d(96, 288, kernel_size=1, bias=False).
    N, Cin, H, W, Cout = 1, 96, 14, 14, 288
    x145 = jax.random.normal(k1, (N, Cin, H, W), dtype=jnp.float32)
    x136 = jax.random.normal(k2, (N, Cin, H, W), dtype=jnp.float32)
    # PyTorch weight shape is (288, 96, 1, 1); trailing 1x1 squeezed -> (Cout, Cin).
    fan_in = Cin
    weight = jax.random.uniform(
        k3, (Cout, Cin), dtype=jnp.float32,
        minval=-1.0 / jnp.sqrt(fan_in), maxval=1.0 / jnp.sqrt(fan_in),
    )

    out = add_conv1x1(x145, x136, weight)
    out = jax.block_until_ready(out)
    assert out.shape == (N, Cout, H, W), out.shape

    # Cross-check against a plain-JAX f32 reference of the same math.
    # Tolerance is relaxed vs the pure-f32 version because operands are cast to
    # bf16 on the MXU (f32 accumulation); expected error ~1e-3..1e-2 absolute.
    ref = jnp.einsum("nchw,oc->nohw", x145 + x136, weight)
    assert jnp.allclose(out, ref, atol=3e-2, rtol=3e-2)

    print("KERNEL_OK")
</pallas_src>

<mosaic_0001>
module attributes {stable_mosaic.version = 11 : i64} {
  func.func @add_conv1x1_kernel(%arg0: memref<96x196xf32, #tpu.memory_space<vmem>>, %arg1: memref<96x196xf32, #tpu.memory_space<vmem>>, %arg2: memref<288x96xf32, #tpu.memory_space<vmem>>, %arg3: memref<288x196xf32, #tpu.memory_space<vmem>>) attributes {dimension_semantics = [], scalar_prefetch = 0 : i64, scratch_operands = 0 : i64, tpu.core_type = #tpu.core_type<tc>} {
    %c0 = arith.constant 0 : index
    %c0_0 = arith.constant 0 : index
    %0 = vector.load %arg0[%c0, %c0_0] : memref<96x196xf32, #tpu.memory_space<vmem>>, vector<96x196xf32>
    %c0_1 = arith.constant 0 : index
    %c0_2 = arith.constant 0 : index
    %1 = vector.load %arg1[%c0_1, %c0_2] : memref<96x196xf32, #tpu.memory_space<vmem>>, vector<96x196xf32>
    %2 = arith.addf %0, %1 : vector<96x196xf32>
    %3 = arith.truncf %2 : vector<96x196xf32> to vector<96x196xbf16>
    %c0_3 = arith.constant 0 : index
    %c0_4 = arith.constant 0 : index
    %4 = vector.load %arg2[%c0_3, %c0_4] : memref<288x96xf32, #tpu.memory_space<vmem>>, vector<288x96xf32>
    %5 = arith.truncf %4 : vector<288x96xf32> to vector<288x96xbf16>
    %cst = arith.constant dense<0.000000e+00> : vector<288x196xf32>
    %6 = tpu.matmul %5, %3, %cst {dimension_numbers = #tpu.dot_dimension_numbers<[1], [0], [0], [1], [0, 0, 1, 1], [], []>} : vector<288x96xbf16>, vector<96x196xbf16>, vector<288x196xf32> -> vector<288x196xf32>
    %c0_5 = arith.constant 0 : index
    %c0_6 = arith.constant 0 : index
    %7 = vector.load %arg3[%c0_5, %c0_6] : memref<288x196xf32, #tpu.memory_space<vmem>>, vector<288x196xf32>
    tpu.vector_store %arg3[%c0_5, %c0_6], %6 {strides = array<i32>} : memref<288x196xf32, #tpu.memory_space<vmem>>, vector<288x196xf32>,
    return
  }
}

</mosaic_0001>

<bundles_post_ra>
// kernel: tpu_custom_call.1
= control target key start
LH: loop header
LB: loop body
LE: loop exit
PB: predicated region body
PF: predicated region fallthrough
CT: control target
= control target key end

     0   :  { %8 = vsyncpa [#allocation3], 0  ;;  %s801_s0 = inlined_call_operand.hbm [shape: f32[96,196], index: 0, kind: input, shape index: {}]   ;;  %s802_s1 = inlined_call_operand.hbm [shape: f32[96,196], index: 1, kind: input, shape index: {}]   ;;  %s803_s2 = inlined_call_operand.hbm [shape: f32[288,96], index: 2, kind: input, shape index: {}]   ;;  %s804_s3 = inlined_call_operand.hbm [shape: f32[288,196], index: 3, kind: output, shape index: {}]  }
   0x1   :  { %9 = vsyncpa [#allocation6], 0 }
   0x2   :  { %10 = vsyncpa [#allocation4], 0  ;;  %s679_s12 = smov [#allocation5]   ;;  %s680_s14 = smov [#allocation2]  }
   0x3   :  { %s28_s13 = sshll.u32 %s679_s12, 4  ;;  %s16_s15 = sshll.u32 %s680_s14, 4  ;;  %s29_s13 = int_to_ptr.vmem [resolvable:$true] %s28_s13  ;;  %s17_s15 = int_to_ptr.vmem [resolvable:$true] %s16_s15 }
   0x4   :  { %s601_s16 = scalar_lea.vmem %s29_s13, 3072  ;;  %p606_p1 = scmp.lt.s32.totalorder %s29_s13, %s29_s13 }
   0x5   :  { %p602_p0 = scmp.ne.s32.totalorder %s29_s13, %s601_s16  ;;  %p607_p2 = scmp.lt.s32.totalorder %s601_s16, %s601_s16 }
   0x7   :  { %p608_p3 = por %p607_p2, %p606_p1 }
   0x9   :  { %p609_p4 = pnand %p608_p3, %p602_p0 }
   0xb   :  { %612 = shalt.err (!%p609_p4)
}
   0xc   :  { %s681_s17 = smov 256   ;;  %s682_s18 = smov 16  }
   0xd   :  { %34 = dma.hbm_to_vmem [thread:$0]  %s802_s1, 3072, %s29_s13, [#allocation6], %s681_s17, %s681_s17, %s682_s18  }
   0xe   :  { %s621_s21 = scalar_lea.vmem %s17_s15, 3072  ;;  %p626_p6 = scmp.lt.s32.totalorder %s17_s15, %s17_s15 }
   0xf   :  { %p622_p5 = scmp.ne.s32.totalorder %s17_s15, %s621_s21  ;;  %p627_p7 = scmp.lt.s32.totalorder %s621_s21, %s621_s21 }
  0x11   :  { %p628_p8 = por %p627_p7, %p626_p6 }
  0x13   :  { %p629_p9 = pnand %p628_p8, %p622_p5 }
  0x15   :  { %632 = shalt.err (!%p629_p9)
}
  0x16   :  { %22 = dma.hbm_to_vmem [thread:$0]  %s801_s0, 3072, %s17_s15, [#allocation3], %s681_s17, %s681_s17, %s682_s18  }
  0x17   :  { %s683_s24 = smov [#allocation7]  }
  0x18   :  { %s40_s25 = sshll.u32 %s683_s24, 4  ;;  %s41_s25 = int_to_ptr.vmem [resolvable:$true] %s40_s25 }
  0x19   :  { %s641_s26 = scalar_lea.vmem %s41_s25, 4608  ;;  %p646_p11 = scmp.lt.s32.totalorder %s41_s25, %s41_s25 }
  0x1a   :  { %p642_p10 = scmp.ne.s32.totalorder %s41_s25, %s641_s26  ;;  %p647_p12 = scmp.lt.s32.totalorder %s641_s26, %s641_s26 }
  0x1c   :  { %p648_p13 = por %p647_p12, %p646_p11 }
  0x1e   :  { %p649_p0 = pnand %p648_p13, %p642_p10 }
  0x20   :  { %652 = shalt.err (!%p649_p0)
}
  0x21   :  { %s684_s1 = smov 128   ;;  %s685_s27 = smov 8  }
  0x22   :  { %46 = dma.hbm_to_vmem [thread:$0]  %s803_s2, 4608, %s41_s25, [#allocation6], %s684_s1, %s684_s1, %s685_s27  }
  0x23   :  { %673 = dma.done.wait [#allocation3], 3072  }
  0x24   :  { %674 = vsyncadd [#allocation3], 4294964224 }
  0x25   :  { %675 = dma.done.wait [#allocation6], 7680  }
  0x26   :  { %676 = vsyncadd [#allocation6], 4294959616  ;;  %v686_v0 = vmov 0   ;;  %v78_v1 = vld [vmem:[#allocation2 + $0xa8] sm:$0xff]  ;;  %v80_v2 = vld [vmem:[#allocation2 + $0xb8] sm:$0xff]  ;;  %vm195_vm0 = vcmask 785408  }
  0x27   :  { %282 = vmatprep.mubr.bf16.mxu0 %v686_v0  ;;  %372 = vmatprep.mubr.bf16.mxu1 %v686_v0  ;;  %v102_v3 = vld [vmem:[#allocation5 + $0xa8] sm:$0xff]  ;;  %v104_v4 = vld [vmem:[#allocation5 + $0xb8] sm:$0xff]  ;;  %v77_v6 = vld [vmem:[#allocation2 + $0xa0] sm:$0xff]  ;;  %vm464_vm1 = vcmask 556032   ;;  %s687_s0 = smov [#allocation8]  }
  0x28   :  { %v126_v5 = vadd.f32 %v102_v3, %v78_v1  ;;  %v79_v7 = vld [vmem:[#allocation2 + $0xb0] sm:$0xff]  ;;  %v128_v8 = vadd.f32 %v104_v4, %v80_v2  ;;  %v101_v9 = vld [vmem:[#allocation5 + $0xa0] sm:$0xff]  ;;  %v74_v11 = vld [vmem:[#allocation2 + $0x88] sm:$0xff]  ;;  %s541_s2 = sshll.u32 %s687_s0, 4  ;;  %s542_s2 = int_to_ptr.vmem [resolvable:$true] %s541_s2 }
  0x29   :  { %v103_v10 = vld [vmem:[#allocation5 + $0xb0] sm:$0xff]  ;;  %v125_v12 = vadd.f32 %v101_v9, %v77_v6  ;;  %v76_v14 = vld [vmem:[#allocation2 + $0x98] sm:$0xff]  ;;  %v98_v15 = vld [vmem:[#allocation5 + $0x88] sm:$0xff]  ;;  %s653_s30 = scalar_lea.vmem %s542_s2, 9216  ;;  %p658_p2 = scmp.lt.s32.totalorder %s542_s2, %s542_s2 }
  0x2a   :  { %v127_v13 = vadd.f32 %v103_v10, %v79_v7  ;;  %v100_v16 = vld [vmem:[#allocation5 + $0x98] sm:$0xff]  ;;  %v140_v17 = vpack.c.bf16 %v128_v8, %v126_v5  ;;  %v122_v18 = vadd.f32 %v98_v15, %v74_v11  ;;  %v73_v20 = vld [vmem:[#allocation2 + $0x80] sm:$0xff]  ;;  %v75_v21 = vld [vmem:[#allocation2 + $0x90] sm:$0xff]  ;;  %p654_p1 = scmp.ne.s32.totalorder %s542_s2, %s653_s30  ;;  %p659_p3 = scmp.lt.s32.totalorder %s653_s30, %s653_s30 }
  0x2b   :  { %v124_v19 = vadd.f32 %v100_v16, %v76_v14  ;;  %v97_v22 = vld [vmem:[#allocation5 + $0x80] sm:$0xff]  ;;  %v99_v24 = vld [vmem:[#allocation5 + $0x90] sm:$0xff]  ;;  %v70_v26 = vld [vmem:[#allocation2 + $0x68] sm:$0xff] }
  0x2c   :  { %v139_v23 = vpack.c.bf16 %v127_v13, %v125_v12  ;;  %v121_v25 = vadd.f32 %v97_v22, %v73_v20  ;;  %v72_v27 = vld [vmem:[#allocation2 + $0x78] sm:$0xff]  ;;  %254 = vmatprep.subr.bf16.mxu0 %v140_v17  ;;  %572 = vmatprep.subr.bf16.mxu1 %v140_v17  ;;  %v123_v29 = vadd.f32 %v99_v24, %v75_v21  ;;  %v94_v30 = vld [vmem:[#allocation5 + $0x68] sm:$0xff]  ;;  %v69_v32 = vld [vmem:[#allocation2 + $0x60] sm:$0xff]  ;;  %p660_p4 = por %p659_p3, %p658_p2 }
  0x2d   :  { %v138_v28 = vpack.c.bf16 %v124_v19, %v122_v18  ;;  %v96_v31 = vld [vmem:[#allocation5 + $0x78] sm:$0xff]  ;;  %v118_v33 = vadd.f32 %v94_v30, %v70_v26  ;;  %v71_v35 = vld [vmem:[#allocation2 + $0x70] sm:$0xff]  ;;  %v93_v36 = vld [vmem:[#allocation5 + $0x60] sm:$0xff] }
  0x2e   :  { %255 = vmatpush1.bf16.msra.mxu0 %v139_v23  ;;  %578 = vmatpush1.bf16.msra.mxu1 %v139_v23  ;;  %v120_v34 = vadd.f32 %v96_v31, %v72_v27  ;;  %v95_v37 = vld [vmem:[#allocation5 + $0x70] sm:$0xff]  ;;  %v137_v38 = vpack.c.bf16 %v123_v29, %v121_v25  ;;  %v117_v39 = vadd.f32 %v93_v36, %v69_v32  ;;  %v66_v41 = vld [vmem:[#allocation2 + $0x48] sm:$0xff]  ;;  %v68_v42 = vld [vmem:[#allocation2 + $0x58] sm:$0xff]  ;;  %p661_p5 = pnand %p660_p4, %p654_p1 }
  0x2f   :  { %256 = vmatprep.subr.bf16.mxu0 %v138_v28  ;;  %573 = vmatprep.subr.bf16.mxu1 %v138_v28  ;;  %v119_v40 = vadd.f32 %v95_v37, %v71_v35  ;;  %v90_v43 = vld [vmem:[#allocation5 + $0x48] sm:$0xff]  ;;  %v92_v45 = vld [vmem:[#allocation5 + $0x58] sm:$0xff]  ;;  %v65_v47 = vld [vmem:[#allocation2 + $0x40] sm:$0xff] }
  0x30   :  { %v136_v44 = vpack.c.bf16 %v120_v34, %v118_v33  ;;  %v114_v46 = vadd.f32 %v90_v43, %v66_v41  ;;  %v67_v48 = vld [vmem:[#allocation2 + $0x50] sm:$0xff]  ;;  %v116_v49 = vadd.f32 %v92_v45, %v68_v42  ;;  %v89_v50 = vld [vmem:[#allocation5 + $0x40] sm:$0xff]  ;;  %v62_v52 = vld [vmem:[#allocation2 + $0x28] sm:$0xff] }
  0x31   :  { %v91_v51 = vld [vmem:[#allocation5 + $0x50] sm:$0xff]  ;;  %v135_v53 = vpack.c.bf16 %v119_v40, %v117_v39  ;;  %v113_v54 = vadd.f32 %v89_v50, %v65_v47  ;;  %v64_v56 = vld [vmem:[#allocation2 + $0x38] sm:$0xff]  ;;  %v86_v57 = vld [vmem:[#allocation5 + $0x28] sm:$0xff] }
  0x32   :  { %257 = vmatpush1.bf16.msra.mxu0 %v137_v38  ;;  %579 = vmatpush1.bf16.msra.mxu1 %v137_v38  ;;  %v115_v55 = vadd.f32 %v91_v51, %v67_v48  ;;  %v88_v58 = vld [vmem:[#allocation5 + $0x38] sm:$0xff]  ;;  %v134_v59 = vpack.c.bf16 %v116_v49, %v114_v46  ;;  %v110_v60 = vadd.f32 %v86_v57, %v62_v52  ;;  %v61_v62 = vld [vmem:[#allocation2 + $0x20] sm:$0xff]  ;;  %v63_v63 = vld [vmem:[#allocation2 + $0x30] sm:$0xff] }
  0x33   :  { %258 = vmatprep.subr.bf16.mxu0 %v136_v44  ;;  %574 = vmatprep.subr.bf16.mxu1 %v136_v44  ;;  %v112_v61 = vadd.f32 %v88_v58, %v64_v56  ;;  %v85_v1 = vld [vmem:[#allocation5 + $0x20] sm:$0xff]  ;;  %v87_v2 = vld [vmem:[#allocation5 + $0x30] sm:$0xff]  ;;  %v58_v3 = vld [vmem:[#allocation2 + $0x8] sm:$0xff] }
  0x34   :  { %v60_v4 = vld [vmem:[#allocation2 + $0x18] sm:$0xff]  ;;  %v82_v5 = vld [vmem:[#allocation5 + $0x8] sm:$0xff]  ;;  %v133_v7 = vpack.c.bf16 %v115_v55, %v113_v54  ;;  %v109_v8 = vadd.f32 %v85_v1, %v61_v62  ;;  %v111_v9 = vadd.f32 %v87_v2, %v63_v63  ;;  %v57_v10 = vld [vmem:[#allocation2] sm:$0xff] }
  0x35   :  { %v84_v6 = vld [vmem:[#allocation5 + $0x18] sm:$0xff]  ;;  %v132_v11 = vpack.c.bf16 %v112_v61, %v110_v60  ;;  %v106_v12 = vadd.f32 %v82_v5, %v58_v3  ;;  %v59_v14 = vld [vmem:[#allocation2 + $0x10] sm:$0xff]  ;;  %v81_v15 = vld [vmem:[#allocation5] sm:$0xff] }
  0x36   :  { %259 = vmatpush1.bf16.msra.mxu0 %v135_v53  ;;  %580 = vmatpush1.bf16.msra.mxu1 %v135_v53  ;;  %v108_v13 = vadd.f32 %v84_v6, %v60_v4  ;;  %v83_v16 = vld [vmem:[#allocation5 + $0x10] sm:$0xff]  ;;  %v131_v17 = vpack.c.bf16 %v111_v9, %v109_v8  ;;  %v105_v18 = vadd.f32 %v81_v15, %v57_v10  ;;  %v141_v21 = vld [vmem:[#allocation7] sm:$0xff]  ;;  %v142_v23 = vld [vmem:[#allocation7 + $0x8] sm:$0xff] }
  0x37   :  { %260 = vmatprep.subr.bf16.mxu0 %v134_v59  ;;  %575 = vmatprep.subr.bf16.mxu1 %v134_v59  ;;  %v107_v19 = vadd.f32 %v83_v16, %v59_v14  ;;  %v159_v24 = vld [vmem:[#allocation7 + $0x90] sm:$0xff]  ;;  %v160_v25 = vld [vmem:[#allocation7 + $0x98] sm:$0xff]  ;;  %v177_v26 = vpack.c.bf16 %v142_v23, %v141_v21  ;;  %v161_v30 = vld [vmem:[#allocation7 + $0xa0] sm:$0xff] }
  0x38   :  { %v130_v20 = vpack.c.bf16 %v108_v13, %v106_v12  ;;  %v186_v27 = vpack.c.bf16 %v160_v25, %v159_v24  ;;  %v143_v28 = vld [vmem:[#allocation7 + $0x10] sm:$0xff]  ;;  %v144_v29 = vld [vmem:[#allocation7 + $0x18] sm:$0xff]  ;;  %v162_v31 = vld [vmem:[#allocation7 + $0xa8] sm:$0xff] }
  0x39   :  { %v129_v22 = vpack.c.bf16 %v107_v19, %v105_v18  ;;  %v178_v32 = vpack.c.bf16 %v144_v29, %v143_v28  ;;  %v187_v33 = vpack.c.bf16 %v162_v31, %v161_v30  ;;  %v145_v34 = vld [vmem:[#allocation7 + $0x20] sm:$0xff]  ;;  %v146_v35 = vld [vmem:[#allocation7 + $0x28] sm:$0xff]  ;;  %v163_v36 = vld [vmem:[#allocation7 + $0xb0] sm:$0xff] }
  0x3a   :  { %261 = vmatpush1.bf16.msra.mxu0 %v133_v7  ;;  %581 = vmatpush1.bf16.msra.mxu1 %v133_v7  ;;  %v164_v37 = vld [vmem:[#allocation7 + $0xb8] sm:$0xff]  ;;  %v179_v38 = vpack.c.bf16 %v146_v35, %v145_v34  ;;  %v147_v40 = vld [vmem:[#allocation7 + $0x30] sm:$0xff]  ;;  %v165_v42 = vld [vmem:[#allocation7 + $0xc0] sm:$0xff] }
  0x3b   :  { %262 = vmatprep.subr.bf16.mxu0 %v132_v11  ;;  %576 = vmatprep.subr.bf16.mxu1 %v132_v11  ;;  %v188_v39 = vpack.c.bf16 %v164_v37, %v163_v36  ;;  %v148_v41 = vld [vmem:[#allocation7 + $0x38] sm:$0xff]  ;;  %v166_v43 = vld [vmem:[#allocation7 + $0xc8] sm:$0xff]  ;;  %v149_v46 = vld [vmem:[#allocation7 + $0x40] sm:$0xff] }
  0x3c   :  { %v180_v44 = vpack.c.bf16 %v148_v41, %v147_v40  ;;  %v189_v45 = vpack.c.bf16 %v166_v43, %v165_v42  ;;  %v150_v47 = vld [vmem:[#allocation7 + $0x48] sm:$0xff]  ;;  %v167_v48 = vld [vmem:[#allocation7 + $0xd0] sm:$0xff]  ;;  %v168_v49 = vld [vmem:[#allocation7 + $0xd8] sm:$0xff] }
  0x3d   :  { %v181_v50 = vpack.c.bf16 %v150_v47, %v149_v46  ;;  %v190_v51 = vpack.c.bf16 %v168_v49, %v167_v48  ;;  %v151_v52 = vld [vmem:[#allocation7 + $0x50] sm:$0xff]  ;;  %v152_v53 = vld [vmem:[#allocation7 + $0x58] sm:$0xff]  ;;  %v169_v54 = vld [vmem:[#allocation7 + $0xe0] sm:$0xff] }
  0x3e   :  { %263 = vmatpush1.bf16.msra.mxu0 %v131_v17  ;;  %582 = vmatpush1.bf16.msra.mxu1 %v131_v17  ;;  %v170_v55 = vld [vmem:[#allocation7 + $0xe8] sm:$0xff]  ;;  %v182_v56 = vpack.c.bf16 %v152_v53, %v151_v52  ;;  %v153_v58 = vld [vmem:[#allocation7 + $0x60] sm:$0xff]  ;;  %v171_v60 = vld [vmem:[#allocation7 + $0xf0] sm:$0xff] }
  0x3f   :  { %264 = vmatprep.subr.bf16.mxu0 %v130_v20  ;;  %577 = vmatprep.subr.bf16.mxu1 %v130_v20  ;;  %v191_v57 = vpack.c.bf16 %v170_v55, %v169_v54  ;;  %v154_v59 = vld [vmem:[#allocation7 + $0x68] sm:$0xff]  ;;  %v172_v61 = vld [vmem:[#allocation7 + $0xf8] sm:$0xff]  ;;  %v155_v1 = vld [vmem:[#allocation7 + $0x70] sm:$0xff] }
  0x40   :  { %v183_v62 = vpack.c.bf16 %v154_v59, %v153_v58  ;;  %v192_v63 = vpack.c.bf16 %v172_v61, %v171_v60  ;;  %v156_v2 = vld [vmem:[#allocation7 + $0x78] sm:$0xff]  ;;  %v173_v3 = vld [vmem:[#allocation7 + $0x100] sm:$0xff]  ;;  %v174_v4 = vld [vmem:[#allocation7 + $0x108] sm:$0xff] }
  0x41   :  { %v184_v5 = vpack.c.bf16 %v156_v2, %v155_v1  ;;  %v193_v6 = vpack.c.bf16 %v174_v4, %v173_v3  ;;  %v157_v7 = vld [vmem:[#allocation7 + $0x80] sm:$0xff]  ;;  %v158_v8 = vld [vmem:[#allocation7 + $0x88] sm:$0xff]  ;;  %v175_v9 = vld [vmem:[#allocation7 + $0x110] sm:$0xff] }
  0x42   :  { %265 = vmatpush1.bf16.msra.mxu0 %v129_v22  ;;  %583 = vmatpush1.bf16.msra.mxu1 %v129_v22  ;;  %v176_v10 = vld [vmem:[#allocation7 + $0x118] sm:$0xff]  ;;  %v185_v11 = vpack.c.bf16 %v158_v8, %v157_v7 }
  0x43   :  { %v194_v12 = vpack.c.bf16 %v176_v10, %v175_v9 }
  0x45   :  { %554 = vmatmul.mubr.msk.bf16.vlgmr.msra.gmra.mxu0 %vm195_vm0, %v177_v26  ;;  %563 = vmatmul.mubr.msk.bf16.vlgmr.msra.gmra.mxu1 %vm195_vm0, %v186_v27 }
  0x46   :  { %292 = vmatprep.mubr.bf16.mxu0 %v686_v0  ;;  %382 = vmatprep.mubr.bf16.mxu1 %v686_v0 }
  0x4d   :  { %555 = vmatmul.mubr.msk.bf16.gmra.mxu0 %vm195_vm0, %v178_v32  ;;  %564 = vmatmul.mubr.msk.bf16.gmra.mxu1 %vm195_vm0, %v187_v33 }
  0x4e   :  { %302 = vmatprep.mubr.bf16.mxu0 %v686_v0  ;;  %392 = vmatprep.mubr.bf16.mxu1 %v686_v0 }
  0x55   :  { %556 = vmatmul.mubr.msk.bf16.gmra.mxu0 %vm195_vm0, %v179_v38  ;;  %565 = vmatmul.mubr.msk.bf16.gmra.mxu1 %vm195_vm0, %v188_v39 }
  0x56   :  { %312 = vmatprep.mubr.bf16.mxu0 %v686_v0  ;;  %402 = vmatprep.mubr.bf16.mxu1 %v686_v0 }
  0x5d   :  { %557 = vmatmul.mubr.msk.bf16.gmra.mxu0 %vm195_vm0, %v180_v44  ;;  %566 = vmatmul.mubr.msk.bf16.gmra.mxu1 %vm195_vm0, %v189_v45 }
  0x5e   :  { %322 = vmatprep.mubr.bf16.mxu0 %v686_v0  ;;  %412 = vmatprep.mubr.bf16.mxu1 %v686_v0 }
  0x65   :  { %558 = vmatmul.mubr.msk.bf16.gmra.mxu0 %vm195_vm0, %v181_v50  ;;  %567 = vmatmul.mubr.msk.bf16.gmra.mxu1 %vm195_vm0, %v190_v51 }
  0x66   :  { %332 = vmatprep.mubr.bf16.mxu0 %v686_v0  ;;  %422 = vmatprep.mubr.bf16.mxu1 %v686_v0 }
  0x6d   :  { %559 = vmatmul.mubr.msk.bf16.gmra.mxu0 %vm195_vm0, %v182_v56  ;;  %568 = vmatmul.mubr.msk.bf16.gmra.mxu1 %vm195_vm0, %v191_v57 }
  0x6e   :  { %342 = vmatprep.mubr.bf16.mxu0 %v686_v0  ;;  %432 = vmatprep.mubr.bf16.mxu1 %v686_v0 }
  0x75   :  { %560 = vmatmul.mubr.msk.bf16.gmra.mxu0 %vm195_vm0, %v183_v62  ;;  %569 = vmatmul.mubr.msk.bf16.gmra.mxu1 %vm195_vm0, %v192_v63 }
  0x76   :  { %352 = vmatprep.mubr.bf16.mxu0 %v686_v0  ;;  %442 = vmatprep.mubr.bf16.mxu1 %v686_v0 }
  0x7d   :  { %561 = vmatmul.mubr.msk.bf16.gmra.mxu0 %vm195_vm0, %v184_v5  ;;  %570 = vmatmul.mubr.msk.bf16.gmra.mxu1 %vm195_vm0, %v193_v6 }
  0x7e   :  { %362 = vmatprep.mubr.bf16.mxu0 %v686_v0  ;;  %452 = vmatprep.mubr.bf16.mxu1 %v686_v0 }
  0x85   :  { %562 = vmatmul.mubr.msk.bf16.gmra.mxu0 %vm195_vm0, %v185_v11  ;;  %571 = vmatmul.mubr.msk.bf16.gmra.mxu1 %vm195_vm0, %v194_v12 }
 0x105   :  { %v284_v13 = vpop.f32.mrf.mxu0  ;;  %v374_v14 = vpop.f32.mrf.mxu1 }
 0x106   :  { %463 = vst [vmem:[#allocation8] sm:$0xff] %v284_v13  ;;  %500 = vst [vmem:[#allocation8 + $0x120] sm:$0xff] %v374_v14 }
 0x107   :  { %v286_v15 = vpop.f32.mrf.mxu0  ;;  %v376_v16 = vpop.f32.mrf.mxu1 }
 0x108   :  { %465 = vst.msk [vmem:[#allocation8 + $0x8] sm:$0xff] %vm464_vm1, %v286_v15  ;;  %501 = vst.msk [vmem:[#allocation8 + $0x128] sm:$0xff] %vm464_vm1, %v376_v16 }
 0x109   :  { %v288_v0 = vpop.f32.mrf.mxu0  ;;  %v378_v17 = vpop.f32.mrf.mxu1 }
 0x10a   :  { %466 = vst [vmem:[#allocation8 + $0x10] sm:$0xff] %v288_v0  ;;  %502 = vst [vmem:[#allocation8 + $0x130] sm:$0xff] %v378_v17 }
 0x10b   :  { %v290_v18 = vpop.f32.mrf.mxu0  ;;  %v380_v19 = vpop.f32.mrf.mxu1 }
 0x10c   :  { %467 = vst.msk [vmem:[#allocation8 + $0x18] sm:$0xff] %vm464_vm1, %v290_v18  ;;  %503 = vst.msk [vmem:[#allocation8 + $0x138] sm:$0xff] %vm464_vm1, %v380_v19 }
 0x10d   :  { %v294_v20 = vpop.f32.mrf.mxu0  ;;  %v384_v21 = vpop.f32.mrf.mxu1 }
 0x10e   :  { %468 = vst [vmem:[#allocation8 + $0x20] sm:$0xff] %v294_v20  ;;  %504 = vst [vmem:[#allocation8 + $0x140] sm:$0xff] %v384_v21 }
 0x10f   :  { %v296_v22 = vpop.f32.mrf.mxu0  ;;  %v386_v23 = vpop.f32.mrf.mxu1 }
 0x110   :  { %469 = vst.msk [vmem:[#allocation8 + $0x28] sm:$0xff] %vm464_vm1, %v296_v22  ;;  %505 = vst.msk [vmem:[#allocation8 + $0x148] sm:$0xff] %vm464_vm1, %v386_v23 }
 0x111   :  { %v298_v24 = vpop.f32.mrf.mxu0  ;;  %v388_v25 = vpop.f32.mrf.mxu1 }
 0x112   :  { %470 = vst [vmem:[#allocation8 + $0x30] sm:$0xff] %v298_v24  ;;  %506 = vst [vmem:[#allocation8 + $0x150] sm:$0xff] %v388_v25 }
 0x113   :  { %v300_v26 = vpop.f32.mrf.mxu0  ;;  %v390_v27 = vpop.f32.mrf.mxu1 }
 0x114   :  { %471 = vst.msk [vmem:[#allocation8 + $0x38] sm:$0xff] %vm464_vm1, %v300_v26  ;;  %507 = vst.msk [vmem:[#allocation8 + $0x158] sm:$0xff] %vm464_vm1, %v390_v27 }
 0x115   :  { %v304_v28 = vpop.f32.mrf.mxu0  ;;  %v394_v29 = vpop.f32.mrf.mxu1 }
 0x116   :  { %472 = vst [vmem:[#allocation8 + $0x40] sm:$0xff] %v304_v28  ;;  %508 = vst [vmem:[#allocation8 + $0x160] sm:$0xff] %v394_v29 }
 0x117   :  { %v306_v30 = vpop.f32.mrf.mxu0  ;;  %v396_v31 = vpop.f32.mrf.mxu1 }
 0x118   :  { %473 = vst.msk [vmem:[#allocation8 + $0x48] sm:$0xff] %vm464_vm1, %v306_v30  ;;  %509 = vst.msk [vmem:[#allocation8 + $0x168] sm:$0xff] %vm464_vm1, %v396_v31 }
 0x119   :  { %v308_v32 = vpop.f32.mrf.mxu0  ;;  %v398_v33 = vpop.f32.mrf.mxu1 }
 0x11a   :  { %474 = vst [vmem:[#allocation8 + $0x50] sm:$0xff] %v308_v32  ;;  %510 = vst [vmem:[#allocation8 + $0x170] sm:$0xff] %v398_v33 }
 0x11b   :  { %v310_v34 = vpop.f32.mrf.mxu0  ;;  %v400_v35 = vpop.f32.mrf.mxu1 }
 0x11c   :  { %475 = vst.msk [vmem:[#allocation8 + $0x58] sm:$0xff] %vm464_vm1, %v310_v34  ;;  %511 = vst.msk [vmem:[#allocation8 + $0x178] sm:$0xff] %vm464_vm1, %v400_v35 }
 0x11d   :  { %v314_v36 = vpop.f32.mrf.mxu0  ;;  %v404_v37 = vpop.f32.mrf.mxu1 }
 0x11e   :  { %476 = vst [vmem:[#allocation8 + $0x60] sm:$0xff] %v314_v36  ;;  %512 = vst [vmem:[#allocation8 + $0x180] sm:$0xff] %v404_v37 }
 0x11f   :  { %v316_v38 = vpop.f32.mrf.mxu0  ;;  %v406_v39 = vpop.f32.mrf.mxu1 }
 0x120   :  { %477 = vst.msk [vmem:[#allocation8 + $0x68] sm:$0xff] %vm464_vm1, %v316_v38  ;;  %513 = vst.msk [vmem:[#allocation8 + $0x188] sm:$0xff] %vm464_vm1, %v406_v39 }
 0x121   :  { %v318_v40 = vpop.f32.mrf.mxu0  ;;  %v408_v41 = vpop.f32.mrf.mxu1 }
 0x122   :  { %478 = vst [vmem:[#allocation8 + $0x70] sm:$0xff] %v318_v40  ;;  %514 = vst [vmem:[#allocation8 + $0x190] sm:$0xff] %v408_v41 }
 0x123   :  { %v320_v42 = vpop.f32.mrf.mxu0  ;;  %v410_v43 = vpop.f32.mrf.mxu1 }
 0x124   :  { %479 = vst.msk [vmem:[#allocation8 + $0x78] sm:$0xff] %vm464_vm1, %v320_v42  ;;  %515 = vst.msk [vmem:[#allocation8 + $0x198] sm:$0xff] %vm464_vm1, %v410_v43 }
 0x125   :  { %v324_v44 = vpop.f32.mrf.mxu0  ;;  %v414_v45 = vpop.f32.mrf.mxu1 }
 0x126   :  { %480 = vst [vmem:[#allocation8 + $0x80] sm:$0xff] %v324_v44  ;;  %516 = vst [vmem:[#allocation8 + $0x1a0] sm:$0xff] %v414_v45 }
 0x127   :  { %v326_v46 = vpop.f32.mrf.mxu0  ;;  %v416_v47 = vpop.f32.mrf.mxu1 }
 0x128   :  { %481 = vst.msk [vmem:[#allocation8 + $0x88] sm:$0xff] %vm464_vm1, %v326_v46  ;;  %517 = vst.msk [vmem:[#allocation8 + $0x1a8] sm:$0xff] %vm464_vm1, %v416_v47 }
 0x129   :  { %v328_v48 = vpop.f32.mrf.mxu0  ;;  %v418_v49 = vpop.f32.mrf.mxu1 }
 0x12a   :  { %482 = vst [vmem:[#allocation8 + $0x90] sm:$0xff] %v328_v48  ;;  %518 = vst [vmem:[#allocation8 + $0x1b0] sm:$0xff] %v418_v49 }
 0x12b   :  { %v330_v50 = vpop.f32.mrf.mxu0  ;;  %v420_v51 = vpop.f32.mrf.mxu1 }
 0x12c   :  { %483 = vst.msk [vmem:[#allocation8 + $0x98] sm:$0xff] %vm464_vm1, %v330_v50  ;;  %519 = vst.msk [vmem:[#allocation8 + $0x1b8] sm:$0xff] %vm464_vm1, %v420_v51 }
 0x12d   :  { %v334_v52 = vpop.f32.mrf.mxu0  ;;  %v424_v53 = vpop.f32.mrf.mxu1 }
 0x12e   :  { %484 = vst [vmem:[#allocation8 + $0xa0] sm:$0xff] %v334_v52  ;;  %520 = vst [vmem:[#allocation8 + $0x1c0] sm:$0xff] %v424_v53 }
 0x12f   :  { %v336_v54 = vpop.f32.mrf.mxu0  ;;  %v426_v55 = vpop.f32.mrf.mxu1 }
 0x130   :  { %485 = vst.msk [vmem:[#allocation8 + $0xa8] sm:$0xff] %vm464_vm1, %v336_v54  ;;  %521 = vst.msk [vmem:[#allocation8 + $0x1c8] sm:$0xff] %vm464_vm1, %v426_v55 }
 0x131   :  { %v338_v56 = vpop.f32.mrf.mxu0  ;;  %v428_v57 = vpop.f32.mrf.mxu1 }
 0x132   :  { %486 = vst [vmem:[#allocation8 + $0xb0] sm:$0xff] %v338_v56  ;;  %522 = vst [vmem:[#allocation8 + $0x1d0] sm:$0xff] %v428_v57 }
 0x133   :  { %v340_v58 = vpop.f32.mrf.mxu0  ;;  %v430_v59 = vpop.f32.mrf.mxu1 }
 0x134   :  { %487 = vst.msk [vmem:[#allocation8 + $0xb8] sm:$0xff] %vm464_vm1, %v340_v58  ;;  %523 = vst.msk [vmem:[#allocation8 + $0x1d8] sm:$0xff] %vm464_vm1, %v430_v59 }
 0x135   :  { %v344_v60 = vpop.f32.mrf.mxu0  ;;  %v434_v61 = vpop.f32.mrf.mxu1 }
 0x136   :  { %488 = vst [vmem:[#allocation8 + $0xc0] sm:$0xff] %v344_v60  ;;  %524 = vst [vmem:[#allocation8 + $0x1e0] sm:$0xff] %v434_v61 }
 0x137   :  { %v346_v62 = vpop.f32.mrf.mxu0  ;;  %v436_v63 = vpop.f32.mrf.mxu1 }
 0x138   :  { %489 = vst.msk [vmem:[#allocation8 + $0xc8] sm:$0xff] %vm464_vm1, %v346_v62  ;;  %525 = vst.msk [vmem:[#allocation8 + $0x1e8] sm:$0xff] %vm464_vm1, %v436_v63 }
 0x139   :  { %v348_v1 = vpop.f32.mrf.mxu0  ;;  %v438_v2 = vpop.f32.mrf.mxu1 }
 0x13a   :  { %490 = vst [vmem:[#allocation8 + $0xd0] sm:$0xff] %v348_v1  ;;  %526 = vst [vmem:[#allocation8 + $0x1f0] sm:$0xff] %v438_v2 }
 0x13b   :  { %v350_v3 = vpop.f32.mrf.mxu0  ;;  %v440_v4 = vpop.f32.mrf.mxu1 }
 0x13c   :  { %491 = vst.msk [vmem:[#allocation8 + $0xd8] sm:$0xff] %vm464_vm1, %v350_v3  ;;  %527 = vst.msk [vmem:[#allocation8 + $0x1f8] sm:$0xff] %vm464_vm1, %v440_v4 }
 0x13d   :  { %v354_v5 = vpop.f32.mrf.mxu0  ;;  %v444_v6 = vpop.f32.mrf.mxu1 }
 0x13e   :  { %492 = vst [vmem:[#allocation8 + $0xe0] sm:$0xff] %v354_v5  ;;  %528 = vst [vmem:[#allocation8 + $0x200] sm:$0xff] %v444_v6 }
 0x13f   :  { %v356_v7 = vpop.f32.mrf.mxu0  ;;  %v446_v8 = vpop.f32.mrf.mxu1 }
 0x140   :  { %493 = vst.msk [vmem:[#allocation8 + $0xe8] sm:$0xff] %vm464_vm1, %v356_v7  ;;  %529 = vst.msk [vmem:[#allocation8 + $0x208] sm:$0xff] %vm464_vm1, %v446_v8 }
 0x141   :  { %v358_v9 = vpop.f32.mrf.mxu0  ;;  %v448_v10 = vpop.f32.mrf.mxu1 }
 0x142   :  { %494 = vst [vmem:[#allocation8 + $0xf0] sm:$0xff] %v358_v9  ;;  %530 = vst [vmem:[#allocation8 + $0x210] sm:$0xff] %v448_v10 }
 0x143   :  { %v360_v11 = vpop.f32.mrf.mxu0  ;;  %v450_v12 = vpop.f32.mrf.mxu1 }
 0x144   :  { %495 = vst.msk [vmem:[#allocation8 + $0xf8] sm:$0xff] %vm464_vm1, %v360_v11  ;;  %531 = vst.msk [vmem:[#allocation8 + $0x218] sm:$0xff] %vm464_vm1, %v450_v12 }
 0x145   :  { %v364_v13 = vpop.f32.mrf.mxu0  ;;  %v454_v14 = vpop.f32.mrf.mxu1 }
 0x146   :  { %496 = vst [vmem:[#allocation8 + $0x100] sm:$0xff] %v364_v13  ;;  %532 = vst [vmem:[#allocation8 + $0x220] sm:$0xff] %v454_v14 }
 0x147   :  { %v366_v15 = vpop.f32.mrf.mxu0  ;;  %v456_v16 = vpop.f32.mrf.mxu1 }
 0x148   :  { %497 = vst.msk [vmem:[#allocation8 + $0x108] sm:$0xff] %vm464_vm1, %v366_v15  ;;  %533 = vst.msk [vmem:[#allocation8 + $0x228] sm:$0xff] %vm464_vm1, %v456_v16 }
 0x149   :  { %v368_v0 = vpop.f32.mrf.mxu0  ;;  %v458_v17 = vpop.f32.mrf.mxu1 }
 0x14a   :  { %498 = vst [vmem:[#allocation8 + $0x110] sm:$0xff] %v368_v0  ;;  %534 = vst [vmem:[#allocation8 + $0x230] sm:$0xff] %v458_v17 }
 0x14b   :  { %v370_v18 = vpop.f32.mrf.mxu0  ;;  %v460_v19 = vpop.f32.mrf.mxu1 }
 0x14c   :  { %499 = vst.msk [vmem:[#allocation8 + $0x118] sm:$0xff] %vm464_vm1, %v370_v18  ;;  %535 = vst.msk [vmem:[#allocation8 + $0x238] sm:$0xff] %vm464_vm1, %v460_v19 }
 0x14d   :  { %664 = shalt.err (!%p661_p5)
}
 0x14e   :  { %547 = dma.vmem_to_hbm [thread:$0]  %s542_s2, 9216, %s804_s3, [#allocation4], %s681_s17, %s681_s17, %s682_s18  }
 0x14f   :  { %677 = dma.done.wait [#allocation4], 9216  }
 0x150   :  { %678 = vsyncadd [#allocation4], 4294958080 }
 0x151   :  { %551 = vsyncpa [#allocation3], 1 }
 0x152   :  { %552 = vsyncpa [#allocation6], 1 }
 0x153   :  { %553 = vsyncpa [#allocation4], 1 }

</bundles_post_ra>
